<compile_context>
chip_gen: v6e
topology: v6e:2x2x1
jax: 0.10.0
libtpu: 0.0.40
codegen_flags: <defaults>
</compile_context>

<pallas_src>
import math

import jax
import jax.numpy as jnp
from jax.experimental import pallas as pl
from jax.experimental.pallas import tpu as pltpu


def _linear_clamp_kernel(x_ref, w_ref, b_ref, o_ref):
    # x_ref: (TILE_ROWS, 128) packed input (16 logical rows per packed row)
    # w_ref: (128, 256) block-diagonal weight (resident)
    # b_ref: (1, 256) tiled bias (resident)
    # o_ref: (TILE_ROWS, 256) packed output
    y = jnp.dot(x_ref[...], w_ref[...], preferred_element_type=jnp.float32)
    y = y + b_ref[...]
    y = jnp.maximum(y, 0.0)      # clamp_min(0)
    y = jnp.minimum(y, 255.0)    # clamp_max(255)
    o_ref[...] = y.astype(o_ref.dtype)


def _linear_clamp_impl(x, weight, bias, *, tile_rows=1024):
    """clamp(x @ weight + bias, 0, 255) with the linear over the last axis.

    x: (..., K) f32; weight: (K, N); bias: (N,).
    """
    in_features, out_features = weight.shape
    assert 128 % in_features == 0, "packed layout requires in_features | 128"
    pack = 128 // in_features            # logical rows per packed row (16)
    k_packed = pack * in_features        # 128
    n_packed = pack * out_features       # 256

    lead_shape = x.shape[:-1]
    m = math.prod(lead_shape) if lead_shape else 1
    rows = pl.cdiv(m, pack)              # packed rows
    m_packed = rows * pack

    x_flat = x.reshape(m, in_features)
    if m_packed != m:
        # Rare fallback: M not a multiple of PACK -> pad logical rows (copy).
        x_flat = jnp.pad(x_flat, ((0, m_packed - m), (0, 0)))
    # Free (bitcast) reshape: 16 consecutive logical rows -> one 128-lane row.
    x2d = x_flat.reshape(rows, k_packed)

    # Block-diagonal weight (128, 256): W repeated PACK times on the diagonal.
    eye = jnp.eye(pack, dtype=weight.dtype)
    w_bd = jnp.einsum("pq,kn->pkqn", eye, weight).reshape(k_packed, n_packed)
    b_tiled = jnp.tile(bias, pack).reshape(1, n_packed)

    # Tile selection: multiple of 8 sublanes; guarantee >=2 grid steps when
    # there is enough work so v7x's two TensorCores both get a share and the
    # input/output DMAs pipeline across steps.
    tile_cap = max(8, (tile_rows // 8) * 8)
    if rows < 16:
        tile = rows                       # single block == full dim (allowed)
    else:
        tile = min(tile_cap, pl.cdiv(pl.cdiv(rows, 2), 8) * 8)
    grid = (pl.cdiv(rows, tile),)

    # Double-buffered I/O working set + headroom; comfortably under v7x VMEM.
    tile_vmem = 2 * tile * (k_packed + n_packed) * 4
    vmem_limit = int(min(max(tile_vmem + (8 << 20), 16 << 20), 48 << 20))

    out2d = pl.pallas_call(
        _linear_clamp_kernel,
        out_shape=jax.ShapeDtypeStruct((rows, n_packed), x.dtype),
        grid_spec=pltpu.PrefetchScalarGridSpec(
            num_scalar_prefetch=0,
            grid=grid,
            in_specs=[
                pl.BlockSpec((tile, k_packed), lambda i: (i, 0)),        # x tile
                pl.BlockSpec((k_packed, n_packed), lambda i: (0, 0)),    # W_bd
                pl.BlockSpec((1, n_packed), lambda i: (0, 0)),           # bias
            ],
            out_specs=pl.BlockSpec((tile, n_packed), lambda i: (i, 0)),
        ),
        compiler_params=pltpu.CompilerParams(
            dimension_semantics=("parallel",),
            vmem_limit_bytes=vmem_limit,
        ),
        cost_estimate=pl.CostEstimate(
            flops=2 * rows * k_packed * n_packed,
            transcendentals=0,
            bytes_accessed=(rows * (k_packed + n_packed) * 4
                            + k_packed * n_packed * 4 + n_packed * 4),
        ),
    )(x2d, w_bd, b_tiled)

    # Free reshape back: one 256-lane packed row -> 16 logical (.., 16) rows.
    out = out2d.reshape(m_packed, out_features)
    if m_packed != m:
        out = out[:m]
    return out.reshape(*lead_shape, out_features)


linear_clamp = jax.jit(_linear_clamp_impl, static_argnames=("tile_rows",))


if __name__ == "__main__":
    key = jax.random.PRNGKey(0)
    k_w, k_b, k_x1, k_x2, k_x3 = jax.random.split(key, 5)

    in_features, out_features = 8, 16

    # Deterministic "Linear(8, 16)" parameters (Kaiming-uniform-like bounds).
    bound = 1.0 / math.sqrt(in_features)
    weight = jax.random.uniform(k_w, (in_features, out_features),
                                minval=-bound, maxval=bound, dtype=jnp.float32)
    bias = jax.random.uniform(k_b, (out_features,),
                              minval=-bound, maxval=bound, dtype=jnp.float32)

    def ref_fn(x):
        return jnp.clip(jnp.einsum("...k,kn->...n", x, weight) + bias,
                        0.0, 255.0)

    # Case 1: spec-like input (last dim must be 8 for Linear(8, 16)).
    # m = 784 -> 49 packed rows, tile=32, grid=2 (partial last block).
    x1 = jax.random.normal(k_x1, (1, 28, 28, in_features), dtype=jnp.float32)
    out1 = linear_clamp(x1, weight, bias)
    jax.block_until_ready(out1)
    assert out1.shape == (1, 28, 28, out_features)
    assert jnp.allclose(out1, ref_fn(x1), atol=1e-5, rtol=1e-5)

    # Case 2: m = 2048 -> 128 packed rows, tile=64, grid=2 (even split,
    # exercises multi-tile pipelining / dual-TC sharding).
    x2 = jax.random.normal(k_x2, (4, 8, 64, in_features), dtype=jnp.float32)
    out2 = linear_clamp(x2, weight, bias)
    jax.block_until_ready(out2)
    assert out2.shape == (4, 8, 64, out_features)
    assert jnp.allclose(out2, ref_fn(x2), atol=1e-5, rtol=1e-5)

    # Case 3: m = 105 (not a multiple of 16) -> exercises the pad fallback
    # and the single full-dim block path (rows=7).
    x3 = jax.random.normal(k_x3, (3, 5, 7, in_features), dtype=jnp.float32)
    out3 = linear_clamp(x3, weight, bias)
    jax.block_until_ready(out3)
    assert out3.shape == (3, 5, 7, out_features)
    assert jnp.allclose(out3, ref_fn(x3), atol=1e-5, rtol=1e-5)

    print("KERNEL_OK")
</pallas_src>

<mosaic_0001>
module attributes {stable_mosaic.version = 11 : i64} {
  func.func @_linear_clamp_kernel(%arg0: i32, %arg1: memref<32x128xf32, #tpu.memory_space<vmem>>, %arg2: memref<128x256xf32, #tpu.memory_space<vmem>>, %arg3: memref<1x256xf32, #tpu.memory_space<vmem>>, %arg4: memref<32x256xf32, #tpu.memory_space<vmem>>) attributes {dimension_semantics = [#tpu.dimension_semantics<parallel>], iteration_bounds = array<i64: 2>, scalar_prefetch = 0 : i64, scratch_operands = 0 : i64, tpu.core_type = #tpu.core_type<tc>, window_params = [{transform_indices = @transform_0, window_bounds = array<i64: 32, 128>}, {pipeline_mode = #tpu.pipeline_mode<synchronous>, transform_indices = @transform_1, window_bounds = array<i64: 128, 256>}, {pipeline_mode = #tpu.pipeline_mode<synchronous>, transform_indices = @transform_2, window_bounds = array<i64: 1, 256>}, {transform_indices = @transform_3, window_bounds = array<i64: 32, 256>}]} {
    %c0 = arith.constant 0 : index
    %c0_0 = arith.constant 0 : index
    %0 = vector.load %arg1[%c0, %c0_0] : memref<32x128xf32, #tpu.memory_space<vmem>>, vector<32x128xf32>
    %c0_1 = arith.constant 0 : index
    %c0_2 = arith.constant 0 : index
    %1 = vector.load %arg2[%c0_1, %c0_2] : memref<128x256xf32, #tpu.memory_space<vmem>>, vector<128x256xf32>
    %cst = arith.constant dense<0.000000e+00> : vector<32x256xf32>
    %2 = tpu.matmul %0, %1, %cst {dimension_numbers = #tpu.dot_dimension_numbers<[1], [0], [0], [1], [0, 0, 1, 1], [], []>} : vector<32x128xf32>, vector<128x256xf32>, vector<32x256xf32> -> vector<32x256xf32>
    %c0_3 = arith.constant 0 : index
    %c0_4 = arith.constant 0 : index
    %3 = vector.load %arg3[%c0_3, %c0_4] : memref<1x256xf32, #tpu.memory_space<vmem>>, vector<1x256xf32>
    %4 = vector.broadcast %3 : vector<1x256xf32> to vector<32x256xf32>
    %5 = arith.addf %2, %4 : vector<32x256xf32>
    %cst_5 = arith.constant 0.000000e+00 : f32
    %6 = vector.broadcast %cst_5 : f32 to vector<32x256xf32>
    %7 = arith.maximumf %5, %6 : vector<32x256xf32>
    %cst_6 = arith.constant 2.550000e+02 : f32
    %8 = vector.broadcast %cst_6 : f32 to vector<32x256xf32>
    %9 = arith.minimumf %7, %8 : vector<32x256xf32>
    %c0_7 = arith.constant 0 : index
    %c0_8 = arith.constant 0 : index
    %10 = vector.load %arg4[%c0_7, %c0_8] : memref<32x256xf32, #tpu.memory_space<vmem>>, vector<32x256xf32>
    tpu.vector_store %arg4[%c0_7, %c0_8], %9 {strides = array<i32>} : memref<32x256xf32, #tpu.memory_space<vmem>>, vector<32x256xf32>,
    return
  }
  func.func @transform_0(%arg0: i32) -> (i32, i32) {
    %c0_i32 = arith.constant 0 : i32
    %c0_i32_0 = arith.constant 0 : i32
    return %arg0, %c0_i32 : i32, i32
  }
  func.func @transform_1(%arg0: i32) -> (i32, i32) {
    %c0_i32 = arith.constant 0 : i32
    %c0_i32_0 = arith.constant 0 : i32
    %c0_i32_1 = arith.constant 0 : i32
    return %c0_i32, %c0_i32_0 : i32, i32
  }
  func.func @transform_2(%arg0: i32) -> (i32, i32) {
    %c0_i32 = arith.constant 0 : i32
    %c0_i32_0 = arith.constant 0 : i32
    %c0_i32_1 = arith.constant 0 : i32
    return %c0_i32, %c0_i32_0 : i32, i32
  }
  func.func @transform_3(%arg0: i32) -> (i32, i32) {
    %c0_i32 = arith.constant 0 : i32
    %c0_i32_0 = arith.constant 0 : i32
    return %arg0, %c0_i32 : i32, i32
  }
}

</mosaic_0001>

<bundles_post_ra>
// kernel: tile.9
= control target key start
LH: loop header
LB: loop body
LE: loop exit
PB: predicated region body
PF: predicated region fallthrough
CT: control target
= control target key end

     0   :  { %s7_s6 = smov 3  ;;  %s21_s9 = smov 3  ;;  %vm4_vm0 = vcmask 130048   ;;  %vm11_vm1 = vcmask 1048448   ;;  %vm18_vm2 = vcmask 917248   ;;  %vm25_vm3 = vcmask 786048   ;;  %s131_s0 = inlined_call_operand.vmem [shape: f32[16,16], index: 0, kind: input, shape index: {}]   ;;  %s132_s1 = inlined_call_operand.vmem [shape: f32[1,256], index: 1, kind: output, shape index: {}]  }
   0x1   :  { %v69_v0 = vld [vmem:[%s131_s0 + $0x7] ss:$8 sm:%s7_s6]   ;;  %s84_s10 = smov 112   ;;  %v71_v1 = vld [vmem:[%s131_s0 + $0x5] ss:$8 sm:%s21_s9]   ;;  %s14_s13 = smov 3 }
   0x2   :  { %9 = vrot.lane.b32.xlu0 %v69_v0, %s84_s10  ;;  %s85_s14 = smov 80   ;;  %v70_v2 = vld [vmem:[%s131_s0 + $0x6] ss:$8 sm:%s14_s13]   ;;  %s28_s17 = smov 3  ;;  %vm32_vm4 = vcmask 654848   ;;  %vm39_vm5 = vcmask 523648  }
   0x3   :  { %23 = vrot.lane.b32.xlu1 %v71_v1, %s85_s14  ;;  %v72_v3 = vld [vmem:[%s131_s0 + $0x4] ss:$8 sm:%s28_s17]   ;;  %s35_s20 = smov 3  ;;  %s42_s21 = smov 3  ;;  %vm46_vm6 = vcmask 392448   ;;  %vm53_vm7 = vcmask 261248  }
   0x4   :  { %s86_s22 = smov 96   ;;  %s87_s23 = smov 64   ;;  %v73_v4 = vld [vmem:[%s131_s0 + $0x3] ss:$8 sm:%s35_s20]   ;;  %v74_v5 = vld [vmem:[%s131_s0 + $0x2] ss:$8 sm:%s42_s21]  }
   0x5   :  { %s2_s26 = smov 3  ;;  %s49_s29 = smov 3 }
   0x6   :  { %16 = vrot.lane.b32.xlu0 %v70_v2, %s86_s22  ;;  %v3_v6 = vld [vmem:[%s131_s0] ss:$8 sm:%s2_s26]   ;;  %s88_s3 = smov 48   ;;  %s89_s4 = smov 32  }
   0x7   :  { %30 = vrot.lane.b32.xlu1 %v72_v3, %s87_s23  ;;  %5 = vst.msk [vmem:[#allocation0] ss:$8 sm:$0x3] %vm4_vm0, %v3_v6   ;;  %v75_v7 = vld [vmem:[%s131_s0 + $0x1] ss:$8 sm:%s49_s29]   ;;  %s90_s0 = smov 16  }
   0xa   :  { %37 = vrot.lane.b32.xlu0 %v73_v4, %s88_s3 }
   0xb   :  { %44 = vrot.lane.b32.xlu1 %v74_v5, %s89_s4 }
   0xe   :  { %51 = vrot.lane.b32.xlu0 %v75_v7, %s90_s0 }
  0x74   :  { %v10_v8 = vpop.permute.xlu0 %9  }
  0x75   :  { %12 = vst.msk [vmem:[#allocation0] ss:$8 sm:$0x3] %vm11_vm1, %v10_v8   ;;  %v24_v9 = vpop.permute.xlu1 %23  }
  0x78   :  { %v17_v10 = vpop.permute.xlu0 %16  }
  0x79   :  { %19 = vst.msk [vmem:[#allocation0] ss:$8 sm:$0x3] %vm18_vm2, %v17_v10   ;;  %v31_v11 = vpop.permute.xlu1 %30  }
  0x7a   :  { %26 = vst.msk [vmem:[#allocation0] ss:$8 sm:$0x3] %vm25_vm3, %v24_v9  }
  0x7b   :  { %33 = vst.msk [vmem:[#allocation0] ss:$8 sm:$0x3] %vm32_vm4, %v31_v11  }
  0x7c   :  { %v38_v12 = vpop.permute.xlu0 %37  }
  0x7d   :  { %40 = vst.msk [vmem:[#allocation0] ss:$8 sm:$0x3] %vm39_vm5, %v38_v12   ;;  %v45_v13 = vpop.permute.xlu1 %44  }
  0x7e   :  { %47 = vst.msk [vmem:[#allocation0] ss:$8 sm:$0x3] %vm46_vm6, %v45_v13  }
  0x80   :  { %v52_v14 = vpop.permute.xlu0 %51  }
  0x81   :  { %54 = vst.msk [vmem:[#allocation0] ss:$8 sm:$0x3] %vm53_vm7, %v52_v14  }
  0x88   :  { %v59_v15 = vld [vmem:[#allocation0] sm:$0x1]  ;;  %v64_v16 = vld [vmem:[#allocation0 + $0x8] sm:$0x1] }
  0x89   :  { %62 = vst [vmem:[%s132_s1] sm:$0x1] %v59_v15  ;;  %76 = vst [vmem:[%s132_s1 + $0x1] sm:$0x1] %v64_v16 }

// kernel: tile.8
= control target key start
LH: loop header
LB: loop body
LE: loop exit
PB: predicated region body
PF: predicated region fallthrough
CT: control target
= control target key end

     0   :  { %s28_s0 = inlined_call_operand.vmem [shape: f32[16], index: 0, kind: input, shape index: {}]   ;;  %s29_s1 = inlined_call_operand.vmem [shape: f32[16,16], index: 1, kind: output, shape index: {}]  }
   0x1   :  { %v4_v0 = vld [vmem:[%s28_s0] ss:$0 sm:$0xff] }
   0x2   :  { %5 = vst [vmem:[%s29_s1] sm:$0xff] %v4_v0  ;;  %8 = vst [vmem:[%s29_s1 + $0x8] sm:$0xff] %v4_v0 }

// kernel: _linear_clamp_impl.1
= control target key start
LH: loop header
LB: loop body
LE: loop exit
PB: predicated region body
PF: predicated region fallthrough
CT: control target
= control target key end

     0   :  { %s787_s12 = smov 0   ;;  %s789_s13 = smov 0   ;;  %s999_s0 = inlined_call_operand.vmem [shape: f32[49,128], index: 0, kind: input, shape index: {}]   ;;  %s1000_s1 = inlined_call_operand.vmem [shape: f32[128,256], index: 1, kind: input, shape index: {}]   ;;  %s1001_s2 = inlined_call_operand.vmem [shape: f32[1,256], index: 2, kind: input, shape index: {}]   ;;  %s1002_s3 = inlined_call_operand.vmem [shape: f32[49,256], index: 3, kind: output, shape index: {}]  }
   0x1   :  { %s791_s14 = smov 0  }
   0x2 LB: > { %s800_s15 = sadd.s32 4294967295, %s732_s14   ;;  %s802_s16 = sadd.s32 1, %s732_s14   ;;  %s732_s14 = sphi %s791_s14, %s1009_s14   ;;  %s728_s13 = sphi %s789_s13, %s1008_s13   ;;  %s724_s12 = sphi %s787_s12, %s1007_s12  }
   0x3   : > { %s85_s17 = ssub.s32 %s732_s14, %s802_s16  ;;  %s88_s18 = sadd.s32 1, %s728_s13 }
   0x4   : > { %p86_p0 = scmp.eq.s32.totalorder %s85_s17, 0  ;;  %p98_p1 = scmp.ne.s32.totalorder %s728_s13, %s724_s12 }
   0x5   : > { %p99_p2 = scmp.eq.s32.totalorder %s800_s15, 1  ;;  %p529_p3 = scmp.ge.s32.totalorder %s732_s14, 1 }
   0x6   : > { %s810_s19 = scalar_select %p86_p0, %s728_s13, %s88_s18  }
   0x7   : > { %p812_p4 = por %p99_p2, %p98_p1  ;;  %p146_p5 = scmp.lt.s32.totalorder %s732_s14, 3 }
   0x9   : > { %p147_p6 = pnand %p529_p3, %p146_p5 }
   0xa   : > { %s868_s7 = sshll.u32 (!%p147_p6), %s800_s15, 2  ;;  %s170_s4 = sand.u32 (!%p147_p6), 1, %s724_s12  }
   0xb   : > { %150 = sbr.rel (%p147_p6) target bundleno = 295 (0x127), region = 32  ;;  %p178_p7 = scmp.lt.s32.totalorder (!%p147_p6), %s868_s7, 6 }
   0xc   : > { %s530_s5 = sshll.u32 (!%p147_p6), %s170_s4, 6 }
   0xd   : > { %s924_s12 = scalar_lea.vmem (!%p147_p6), [#allocation2], %s530_s5  }
  0x10   : > { %v228_v0 = vld [vmem:[%s1000_s1 + $0xf8] sm:$0xff]  ;;  %v227_v1 = vld [vmem:[%s1000_s1 + $0xf0] sm:$0xff]  ;;  %v226_v2 = vld [vmem:[%s1000_s1 + $0xe8] sm:$0xff]  ;;  %s179_s28 = scalar_select %p178_p7, %s868_s7, 6  ;;  %v766_v34 = vmov 0.0   ;;  %v231_v37 = vlaneseq }
  0x11   : > { %241 = vmatprep.subr.mxu0 %v228_v0  ;;  %557 = vmatprep.subr.mxu1 %v228_v0  ;;  %v225_v3 = vld [vmem:[%s1000_s1 + $0xe0] sm:$0xff]  ;;  %v224_v4 = vld [vmem:[%s1000_s1 + $0xd8] sm:$0xff]  ;;  %v223_v5 = vld [vmem:[%s1000_s1 + $0xd0] sm:$0xff]  ;;  %s362_s6 = ssub.s32 (%p812_p4), 7, %s868_s7  ;;  %s554_s8 = sshll.u32 (%p812_p4), %s800_s15, 6 }
  0x12   : > { %242 = vmatpush1.msra.mxu0 %v227_v1  ;;  %573 = vmatpush1.msra.mxu1 %v227_v1  ;;  %v222_v6 = vld [vmem:[%s1000_s1 + $0xc8] sm:$0xff]  ;;  %v221_v7 = vld [vmem:[%s1000_s1 + $0xc0] sm:$0xff]  ;;  %v220_v8 = vld [vmem:[%s1000_s1 + $0xb8] sm:$0xff]  ;;  %s532_s11 = sshll.u32 %s179_s28, 3  ;;  %v232_v38 = vshrl.u32 %v231_v37, 7  ;;  %p363_p8 = scmp.lt.s32.totalorder (%p812_p4), %s362_s6, 4 }
  0x13   : > { %243 = vmatprep.subr.mxu0 %v226_v2  ;;  %558 = vmatprep.subr.mxu1 %v226_v2  ;;  %v219_v9 = vld [vmem:[%s1000_s1 + $0xb0] sm:$0xff]  ;;  %v218_v10 = vld [vmem:[%s1000_s1 + $0xa8] sm:$0xff]  ;;  %v217_v11 = vld [vmem:[%s1000_s1 + $0xa0] sm:$0xff]  ;;  %s181_s26 = scalar_lea.vmem %s999_s0, %s532_s11  ;;  %s941_s11 = scalar_lea.vmem (%p812_p4), %s1002_s3, %s554_s8  }
  0x14   : > { %244 = vmatpush1.msra.mxu0 %v225_v3  ;;  %574 = vmatpush1.msra.mxu1 %v225_v3  ;;  %v216_v12 = vld [vmem:[%s1000_s1 + $0x98] sm:$0xff]  ;;  %v215_v13 = vld [vmem:[%s1000_s1 + $0x90] sm:$0xff]  ;;  %v214_v14 = vld [vmem:[%s1000_s1 + $0x88] sm:$0xff]  ;;  %v233_v39 = vsub.s32 0, %v232_v38  ;;  %v237_v41 = vsub.s32 1, %v232_v38 }
  0x15   : > { %245 = vmatprep.subr.mxu0 %v224_v4  ;;  %559 = vmatprep.subr.mxu1 %v224_v4  ;;  %v213_v15 = vld [vmem:[%s1000_s1 + $0x80] sm:$0xff]  ;;  %v212_v16 = vld [vmem:[%s1000_s1 + $0x78] sm:$0xff]  ;;  %v211_v17 = vld [vmem:[%s1000_s1 + $0x70] sm:$0xff] }
  0x16   : > { %246 = vmatpush1.msra.mxu0 %v223_v5  ;;  %575 = vmatpush1.msra.mxu1 %v223_v5  ;;  %v210_v18 = vld [vmem:[%s1000_s1 + $0x68] sm:$0xff]  ;;  %v209_v19 = vld [vmem:[%s1000_s1 + $0x60] sm:$0xff]  ;;  %v208_v20 = vld [vmem:[%s1000_s1 + $0x58] sm:$0xff] }
  0x17   : > { %247 = vmatprep.subr.mxu0 %v222_v6  ;;  %560 = vmatprep.subr.mxu1 %v222_v6  ;;  %v207_v21 = vld [vmem:[%s1000_s1 + $0x50] sm:$0xff]  ;;  %v206_v22 = vld [vmem:[%s1000_s1 + $0x48] sm:$0xff]  ;;  %v205_v23 = vld [vmem:[%s1000_s1 + $0x40] sm:$0xff] }
  0x18   : > { %248 = vmatpush1.msra.mxu0 %v221_v7  ;;  %576 = vmatpush1.msra.mxu1 %v221_v7  ;;  %v204_v24 = vld [vmem:[%s1000_s1 + $0x38] sm:$0xff]  ;;  %v203_v25 = vld [vmem:[%s1000_s1 + $0x30] sm:$0xff]  ;;  %v202_v26 = vld [vmem:[%s1000_s1 + $0x28] sm:$0xff] }
  0x19   : > { %249 = vmatprep.subr.mxu0 %v220_v8  ;;  %561 = vmatprep.subr.mxu1 %v220_v8  ;;  %v201_v27 = vld [vmem:[%s1000_s1 + $0x20] sm:$0xff]  ;;  %v200_v28 = vld [vmem:[%s1000_s1 + $0x18] sm:$0xff]  ;;  %v199_v29 = vld [vmem:[%s1000_s1 + $0x10] sm:$0xff] }
  0x1a   : > { %250 = vmatpush1.msra.mxu0 %v219_v9  ;;  %577 = vmatpush1.msra.mxu1 %v219_v9  ;;  %v198_v30 = vld [vmem:[%s1000_s1 + $0x8] sm:$0xff]  ;;  %v197_v31 = vld [vmem:[%s1000_s1] sm:$0xff]  ;;  %v195_v33 = vld [vmem:[%s181_s26 + $0x10] sm:$0xff] }
  0x1b   : > { %251 = vmatprep.subr.mxu0 %v218_v10  ;;  %562 = vmatprep.subr.mxu1 %v218_v10  ;;  %v193_v32 = vld [vmem:[%s181_s26] sm:$0xff]  ;;  %v194_v35 = vld [vmem:[%s181_s26 + $0x8] sm:$0xff]  ;;  %v196_v36 = vld [vmem:[%s181_s26 + $0x18] sm:$0xff] }
  0x1c   : > { %252 = vmatpush1.msra.mxu0 %v217_v11  ;;  %578 = vmatpush1.msra.mxu1 %v217_v11  ;;  %v229_v40 = vld [vmem:[%s1001_s2] sm:$0x3] }
  0x1d   : > { %253 = vmatprep.subr.mxu0 %v216_v12  ;;  %563 = vmatprep.subr.mxu1 %v216_v12  ;;  %v234_v42 = vrot.slane %v229_v40, %v233_v39  ;;  %v238_v43 = vrot.slane %v229_v40, %v237_v41 }
  0x1e   : > { %254 = vmatpush1.msra.mxu0 %v215_v13  ;;  %579 = vmatpush1.msra.mxu1 %v215_v13 }
  0x1f   : > { %255 = vmatprep.subr.mxu0 %v214_v14  ;;  %564 = vmatprep.subr.mxu1 %v214_v14 }
  0x20   : > { %256 = vmatpush1.msra.mxu0 %v213_v15  ;;  %580 = vmatpush1.msra.mxu1 %v213_v15 }
  0x21   : > { %257 = vmatprep.subr.mxu0 %v212_v16  ;;  %565 = vmatprep.subr.mxu1 %v212_v16 }
  0x22   : > { %258 = vmatpush1.msra.mxu0 %v211_v17  ;;  %581 = vmatpush1.msra.mxu1 %v211_v17 }
  0x23   : > { %259 = vmatprep.subr.mxu0 %v210_v18  ;;  %566 = vmatprep.subr.mxu1 %v210_v18 }
  0x24   : > { %260 = vmatpush1.msra.mxu0 %v209_v19  ;;  %582 = vmatpush1.msra.mxu1 %v209_v19 }
  0x25   : > { %261 = vmatprep.subr.mxu0 %v208_v20  ;;  %567 = vmatprep.subr.mxu1 %v208_v20 }
  0x26   : > { %262 = vmatpush1.msra.mxu0 %v207_v21  ;;  %583 = vmatpush1.msra.mxu1 %v207_v21 }
  0x27   : > { %263 = vmatprep.subr.mxu0 %v206_v22  ;;  %568 = vmatprep.subr.mxu1 %v206_v22 }
  0x28   : > { %264 = vmatpush1.msra.mxu0 %v205_v23  ;;  %584 = vmatpush1.msra.mxu1 %v205_v23 }
  0x29   : > { %265 = vmatprep.subr.mxu0 %v204_v24  ;;  %569 = vmatprep.subr.mxu1 %v204_v24 }
  0x2a   : > { %266 = vmatpush1.msra.mxu0 %v203_v25  ;;  %585 = vmatpush1.msra.mxu1 %v203_v25 }
  0x2b   : > { %267 = vmatprep.subr.mxu0 %v202_v26  ;;  %570 = vmatprep.subr.mxu1 %v202_v26 }
  0x2c   : > { %268 = vmatpush1.msra.mxu0 %v201_v27  ;;  %586 = vmatpush1.msra.mxu1 %v201_v27 }
  0x2d   : > { %269 = vmatprep.subr.mxu0 %v200_v28  ;;  %571 = vmatprep.subr.mxu1 %v200_v28 }
  0x2e   : > { %270 = vmatpush1.msra.mxu0 %v199_v29  ;;  %587 = vmatpush1.msra.mxu1 %v199_v29 }
  0x2f   : > { %271 = vmatprep.subr.mxu0 %v198_v30  ;;  %572 = vmatprep.subr.mxu1 %v198_v30 }
  0x30   : > { %272 = vmatpush1.msra.mxu0 %v197_v31  ;;  %588 = vmatpush1.msra.mxu1 %v197_v31 }
  0x31   : > { %305 = vmatprep.mubr.f32.mxu0 %v766_v34  ;;  %317 = vmatprep.mubr.f32.mxu1 %v766_v34 }
  0x32   : > { %306 = vmatmul.mubr.f32.vlgmr.msra.gmra.mxu0 %v193_v32  ;;  %318 = vmatmul.mubr.f32.vlgmr.msra.gmra.mxu1 %v195_v33 }
  0x33   : > { %311 = vmatprep.mubr.f32.mxu0 %v766_v34  ;;  %323 = vmatprep.mubr.f32.mxu1 %v766_v34 }
  0x36   : > { %312 = vmatmul.mubr.f32.gmra.mxu0 %v194_v35  ;;  %324 = vmatmul.mubr.f32.gmra.mxu1 %v196_v36 }
  0xf2   : > { %v307_v44 = vpop.f32.mrf.mxu0  ;;  %v319_v45 = vpop.f32.mrf.mxu1 }
  0xf3   : > { %v308_v46 = vadd.f32 %v307_v44, %v234_v42  ;;  %v320_v47 = vadd.f32 %v319_v45, %v234_v42 }
  0xf4   : > { %v309_v48 = vpop.f32.mrf.mxu0  ;;  %v321_v49 = vpop.f32.mrf.mxu1 }
  0xf5   : > { %v330_v50 = vmax.f32 %v308_v46, 0.0  ;;  %v334_v51 = vmax.f32 %v320_v47, 0.0  ;;  %v310_v52 = vadd.f32 %v309_v48, %v238_v43  ;;  %v322_v53 = vadd.f32 %v321_v49, %v238_v43 }
  0xf6   : > { %v313_v54 = vpop.f32.mrf.mxu0  ;;  %v325_v55 = vpop.f32.mrf.mxu1 }
  0xf7   : > { %v338_v56 = vmin.f32 %v330_v50, 255.0  ;;  %v342_v57 = vmin.f32 %v334_v51, 255.0  ;;  %v331_v58 = vmax.f32 %v310_v52, 0.0  ;;  %v335_v59 = vmax.f32 %v322_v53, 0.0 }
  0xf8   : > { %v314_v60 = vadd.f32 %v313_v54, %v234_v42  ;;  %v326_v61 = vadd.f32 %v325_v55, %v234_v42  ;;  %v315_v62 = vpop.f32.mrf.mxu0  ;;  %v327_v63 = vpop.f32.mrf.mxu1 }
  0xf9   : > { %346 = vst [vmem:[%s924_s12] sm:$0xff] %v338_v56  ;;  %350 = vst [vmem:[%s924_s12 + $0x20] sm:$0xff] %v342_v57  ;;  %v339_v0 = vmin.f32 %v331_v58, 255.0  ;;  %v343_v1 = vmin.f32 %v335_v59, 255.0  ;;  %v316_v2 = vadd.f32 %v315_v62, %v238_v43  ;;  %v328_v3 = vadd.f32 %v327_v63, %v238_v43 }
  0xfa   : > { %v332_v4 = vmax.f32 %v314_v60, 0.0  ;;  %v336_v5 = vmax.f32 %v326_v61, 0.0 }
  0xfb   : > { %347 = vst [vmem:[%s924_s12 + $0x8] sm:$0xff] %v339_v0  ;;  %351 = vst [vmem:[%s924_s12 + $0x28] sm:$0xff] %v343_v1  ;;  %v333_v6 = vmax.f32 %v316_v2, 0.0  ;;  %v337_v7 = vmax.f32 %v328_v3, 0.0  ;;  %360 = sbr.rel (!%p812_p4) target bundleno = 295 (0x127), region = 36 }
  0xfc   : > { %v340_v8 = vmin.f32 %v332_v4, 255.0  ;;  %v344_v9 = vmin.f32 %v336_v5, 255.0 }
  0xfd   : > { %v341_v10 = vmin.f32 %v333_v6, 255.0  ;;  %v345_v11 = vmin.f32 %v337_v7, 255.0 }
  0xfe   : > { %348 = vst [vmem:[%s924_s12 + $0x10] sm:$0xff] %v340_v8  ;;  %352 = vst [vmem:[%s924_s12 + $0x30] sm:$0xff] %v344_v9 }
  0xff   : > { %349 = vst [vmem:[%s924_s12 + $0x18] sm:$0xff] %v341_v10  ;;  %353 = vst [vmem:[%s924_s12 + $0x38] sm:$0xff] %v345_v11 }
 0x100   : > { %s1011_s6 = smov (!%p363_p8, %s362_s6), 4 }
 0x101   : > { %s552_s14 = sshll.u32 %s1011_s6, 8 }
 0x102   : > { %p540_p9 = scmp.eq.s32.totalorder %s552_s14, 0 }
 0x103   : > { %s947_s17 = sshrl.u32 (!%p540_p9), %s1011_s6, 2 }
 0x104   : > { %373 = sbr.rel (%p540_p9) target bundleno = 295 (0x127), region = 40  ;;  %p541_p10 = scmp.le.s32.totalorder (!%p540_p9), %s947_s17, 0 }
 0x109   : > { %482 = sbr.rel (%p541_p10) target bundleno = 278 (0x116), region = 88  ;;  %s1004_s15 = smov (!%p541_p10), %s941_s11 }
 0x10a   : > { %s1005_s20 = smov (!%p541_p10), %s924_s12  ;;  %s956_s7 = smov (!%p541_p10), 0  }
 0x10b   : > { %s958_s18 = smov (!%p541_p10), 0  }
 0x10e LB: >> { %v386_v12 = vld [vmem:[%s740_s20] sm:$0xff]  ;;  %v388_v13 = vld [vmem:[%s740_s20 + $0x10] sm:$0xff]  ;;  %s402_s21 = sadd.s32 1, %s744_s7  ;;  %v394_v16 = vld [vmem:[%s740_s20 + $0x8] sm:$0xff]  ;;  %s380_s18 = sadd.s32 1, %s748_s18   ;;  %s748_s18 = sphi %s958_s18, %s380_s18   ;;  %s744_s7 = sphi %s956_s7, %s1006_s7   ;;  %s740_s20 = sphi %s1005_s20, %s407_s20   ;;  %s736_s15 = sphi %s1004_s15, %s408_s15  }
 0x10f   : >> { %v390_v14 = vld [vmem:[%s740_s20 + $0x20] sm:$0xff]  ;;  %387 = vst [vmem:[%s736_s15] sm:$0xff] %v386_v12  ;;  %389 = vst [vmem:[%s736_s15 + $0x10] sm:$0xff] %v388_v13  ;;  %v392_v15 = vld [vmem:[%s740_s20 + $0x30] sm:$0xff]  ;;  %p403_p11 = scmp.ge.s32.totalorder %s402_s21, %s947_s17  ;;  %p379_p12 = scmp.ge.s32.totalorder %s380_s18, %s947_s17 }
 0x110   : >> { %391 = vst [vmem:[%s736_s15 + $0x20] sm:$0xff] %v390_v14  ;;  %v396_v17 = vld [vmem:[%s740_s20 + $0x18] sm:$0xff]  ;;  %393 = vst [vmem:[%s736_s15 + $0x30] sm:$0xff] %v392_v15  ;;  %v398_v18 = vld [vmem:[%s740_s20 + $0x28] sm:$0xff] }
 0x111   : >> { %395 = vst [vmem:[%s736_s15 + $0x8] sm:$0xff] %v394_v16  ;;  %397 = vst [vmem:[%s736_s15 + $0x18] sm:$0xff] %v396_v17  ;;  %v400_v19 = vld [vmem:[%s740_s20 + $0x38] sm:$0xff]  ;;  %s1013_s21 = smov (%p403_p11, %s402_s21), 0  ;;  %382 = sbr.rel (!%p379_p12) target bundleno = 270 (0x10e), region = 94 }
 0x112   : >> { %399 = vst [vmem:[%s736_s15 + $0x28] sm:$0xff] %v398_v18  ;;  %401 = vst [vmem:[%s736_s15 + $0x38] sm:$0xff] %v400_v19  ;;  %s542_s22 = sshll.u32 %s1013_s21, 6  ;;  %s1006_s7 = smov %s1013_s21 }
 0x113   : >> { %s407_s20 = scalar_lea.vmem %s924_s12, %s542_s22 [#allocation2]   ;;  %s408_s15 = scalar_lea.vmem %s941_s11, %s542_s22  }
 0x116 PF: > { %s977_s23 = sand.u32 3, %s1011_s6   ;;  %s555_s24 = sshll.u32 %s947_s17, 6 }
 0x117   : > { %s981_s25 = scalar_lea.vmem %s924_s12, %s555_s24 [#allocation2]   ;;  %s415_s26 = scalar_lea.vmem %s941_s11, %s555_s24  }
 0x118   : > { %p547_p13 = scmp.le.s32.totalorder %s977_s23, 0 }
 0x119   : > { %s750_s27 = smov (!%p547_p13), %s415_s26   ;;  %s754_s28 = smov (!%p547_p13), %s981_s25  }
 0x11a   : > { %496 = sbr.rel (%p547_p13) target bundleno = 295 (0x127), region = 99  ;;  %s758_s29 = smov (!%p547_p13), 0  }
 0x11b   : > { %s762_s30 = smov (!%p547_p13), 0  }
 0x11f LB: >> { %v425_v20 = vld [vmem:[%s756_s28] sm:$0xff]  ;;  %v427_v21 = vld [vmem:[%s756_s28 + $0x8] sm:$0xff]  ;;  %s429_s4 = sadd.s32 1, %s760_s29  ;;  %s419_s30 = sadd.s32 1, %s764_s30   ;;  %s764_s30 = sphi %s762_s30, %s419_s30   ;;  %s760_s29 = sphi %s758_s29, %s759_s29   ;;  %s756_s28 = sphi %s754_s28, %s434_s28   ;;  %s752_s27 = sphi %s750_s27, %s435_s27  }
 0x120   : >> { %426 = vst [vmem:[%s752_s27] sm:$0xff] %v425_v20  ;;  %428 = vst [vmem:[%s752_s27 + $0x8] sm:$0xff] %v427_v21  ;;  %p430_p0 = scmp.ge.s32.totalorder %s429_s4, %s977_s23  ;;  %p418_p1 = scmp.ge.s32.totalorder %s419_s30, %s977_s23 }
 0x122   : >> { %s1015_s4 = smov (%p430_p0, %s429_s4), 0  ;;  %421 = sbr.rel (!%p418_p1) target bundleno = 287 (0x11f), region = 105 }
 0x123   : >> { %s548_s5 = sshll.u32 %s1015_s4, 4  ;;  %s759_s29 = smov %s1015_s4  }
 0x124   : >> { %s434_s28 = scalar_lea.vmem %s981_s25, %s548_s5 [#allocation2]   ;;  %s435_s27 = scalar_lea.vmem %s415_s26, %s548_s5  }
 0x127 PF: > { %p10_p2 = scmp.ge.s32.totalorder %s802_s16, 4   ;;  %s1007_s12 = smov %s728_s13 }
 0x128   : > { %s1008_s13 = smov %s810_s19  ;;  %s1009_s14 = smov %s802_s16 }
 0x129   :  { %12 = sbr.rel (!%p10_p2) target bundleno = 2 (0x2), region = 116 }

</bundles_post_ra>
